<compile_context>
chip_gen: v5e
topology: v5e:2x2
jax: 0.10.0
libtpu: 0.0.40
codegen_flags: <defaults>
</compile_context>

<pallas_src>
import functools

import numpy as np
import jax
import jax.numpy as jnp
from jax import lax
from jax.experimental import pallas as pl
from jax.experimental.pallas import tpu as pltpu


def _optimal_kernel_size(channels: int) -> int:
    return 3 if channels % 3 == 0 else 5 if channels % 5 == 0 else 7


# ---------------- single-pass kernel (one batch element fits in a block) ----

def _channel_attention_kernel(x_ref, w1t_ref, w2t_ref, o_ref):
    # x_ref: (Bn, C, HW) -- channels on sublanes, full flattened spatial on
    # lanes (equal to the array dim, so no padding / masking is needed).
    x = x_ref[...]
    bn, _, hw = x.shape

    # AdaptiveAvgPool2d(1): f32 accumulation without materializing an f32 copy
    # of the block.  AdaptiveMaxPool2d(1): max in the native dtype; only the
    # small (Bn, C) result is cast.
    avg = jnp.sum(x, axis=-1, dtype=jnp.float32) * (1.0 / hw)      # (Bn, C)
    mx = jnp.max(x, axis=-1).astype(jnp.float32)                   # (Bn, C)

    # Center-tap linear maps (exact because the conv input is 1x1 with padding
    # k//2 and bias=False).  Fuse the avg/max branches into one dot per layer.
    pooled = jnp.concatenate([avg, mx], axis=0)                    # (2Bn, C)
    h = jnp.maximum(
        jnp.dot(pooled, w1t_ref[...], preferred_element_type=jnp.float32), 0.0)
    z = jnp.dot(h, w2t_ref[...], preferred_element_type=jnp.float32)
    gate = jax.nn.sigmoid(z[:bn] + z[bn:]).astype(x.dtype)         # (Bn, C)

    # Broadcast multiply stays in the input dtype.
    o_ref[...] = x * gate[:, :, None]


# ---------------- two-pass fallback for large H*W ---------------------------

def _gate_reduce_kernel(x_ref, w1t_ref, w2t_ref, gate_ref, sum_sc, max_sc, *,
                        hw_real, hw_tile):
    t = pl.program_id(1)

    @pl.when(t == 0)
    def _():
        sum_sc[...] = jnp.zeros_like(sum_sc)
        max_sc[...] = jnp.full_like(max_sc, -jnp.inf)

    x = x_ref[...]                                        # (1, C, Thw)
    # Only the tail tile has invalid lanes; a (1,1,Thw) lane mask is cheap.
    lane = lax.broadcasted_iota(jnp.int32, (1, 1, hw_tile), 2)
    valid = lane < (hw_real - t * hw_tile)
    xs = jnp.where(valid, x, 0)
    xm = jnp.where(valid, x, -jnp.inf)
    sum_sc[...] += jnp.sum(xs, axis=-1, dtype=jnp.float32)
    max_sc[...] = jnp.maximum(max_sc[...],
                              jnp.max(xm, axis=-1).astype(jnp.float32))

    @pl.when(t == pl.num_programs(1) - 1)
    def _():
        avg = sum_sc[...] * (1.0 / hw_real)               # (1, C)
        pooled = jnp.concatenate([avg, max_sc[...]], axis=0)       # (2, C)
        h = jnp.maximum(
            jnp.dot(pooled, w1t_ref[...], preferred_element_type=jnp.float32),
            0.0)
        z = jnp.dot(h, w2t_ref[...], preferred_element_type=jnp.float32)
        gate_ref[...] = jax.nn.sigmoid(z[:1] + z[1:])[:, :, None]  # (1, C, 1)


def _scale_kernel(x_ref, gate_ref, o_ref):
    # (1, C, Thw) * (1, C, 1) broadcast, in the input dtype.
    o_ref[...] = x_ref[...] * gate_ref[...].astype(o_ref.dtype)


# ---------------- per-generation configuration & blocking -------------------

def _tpu_config():
    kind = ""
    try:
        kind = jax.devices()[0].device_kind.lower()
    except Exception:
        pass
    if "v7" in kind or "7x" in kind:
        # 64 MiB physical VMEM, fastest HBM: ~6 MiB blocks, 48 MiB scoped
        # limit, and keep >=2 grid steps so the batch axis shards over 2 TCs.
        return {"target_bytes": 6 << 20, "vmem_limit": 48 << 20, "two_steps": True}
    if "v6" in kind:
        return {"target_bytes": 12 << 20, "vmem_limit": 96 << 20, "two_steps": False}
    if "v5" in kind:
        return {"target_bytes": 6 << 20, "vmem_limit": 64 << 20, "two_steps": False}
    return {"target_bytes": 4 << 20, "vmem_limit": None, "two_steps": False}


def _compiler_params(semantics, vmem_limit):
    if vmem_limit is None:
        return pltpu.CompilerParams(dimension_semantics=semantics)
    return pltpu.CompilerParams(dimension_semantics=semantics,
                                vmem_limit_bytes=vmem_limit)


def _choose_batch_block(N, per_batch_bytes, target_bytes, two_steps):
    """Batch elements per block, or None if one element exceeds the budget."""
    if per_batch_bytes > target_bytes:
        return None
    max_fit = min(N, max(1, target_bytes // per_batch_bytes))
    # Prefer a divisor of N (no partial tail block) unless it costs >2x steps.
    best_div = max(bn for bn in range(1, max_fit + 1) if N % bn == 0)
    bn = best_div if 2 * best_div >= max_fit else max_fit
    # v7x only: keep >=2 grid steps for megacore sharding, but never shrink
    # blocks below ~1 MiB to do it.
    if two_steps and N > 1 and pl.cdiv(N, bn) < 2:
        cand = pl.cdiv(N, 2)
        if cand * per_batch_bytes >= (1 << 20):
            bn = cand
    return bn


def _choose_hw_tile(HW, C, itemsize, target_bytes):
    t = max(128, (target_bytes // (C * itemsize)) // 128 * 128)
    return min(t, HW)


def _channel_attention_spatial_tiled(x3, w1t, w2t, target_bytes, vmem_limit):
    """Two-pass path for large H*W: (1) reduce sum/max per channel over H*W
    tiles and compute the gate, (2) apply x * gate tile-by-tile."""
    N, C, HW = x3.shape
    hidden = w1t.shape[1]
    thw = _choose_hw_tile(HW, C, x3.dtype.itemsize, target_bytes)
    n_hw = pl.cdiv(HW, thw)

    gate = pl.pallas_call(
        functools.partial(_gate_reduce_kernel, hw_real=HW, hw_tile=thw),
        out_shape=jax.ShapeDtypeStruct((N, C, 1), jnp.float32),
        grid_spec=pltpu.PrefetchScalarGridSpec(
            num_scalar_prefetch=0,
            grid=(N, n_hw),
            in_specs=[
                pl.BlockSpec((1, C, thw), lambda b, t: (b, 0, t)),
                pl.BlockSpec((C, hidden), lambda b, t: (0, 0)),
                pl.BlockSpec((hidden, C), lambda b, t: (0, 0)),
            ],
            out_specs=pl.BlockSpec((1, C, 1), lambda b, t: (b, 0, 0)),
            scratch_shapes=[pltpu.VMEM((1, C), jnp.float32),
                            pltpu.VMEM((1, C), jnp.float32)],
        ),
        compiler_params=_compiler_params(("parallel", "arbitrary"), vmem_limit),
    )(x3, w1t, w2t)

    out3 = pl.pallas_call(
        _scale_kernel,
        out_shape=jax.ShapeDtypeStruct((N, C, HW), x3.dtype),
        grid_spec=pltpu.PrefetchScalarGridSpec(
            num_scalar_prefetch=0,
            grid=(N, n_hw),
            in_specs=[
                pl.BlockSpec((1, C, thw), lambda b, t: (b, 0, t)),
                pl.BlockSpec((1, C, 1), lambda b, t: (b, 0, 0)),
            ],
            out_specs=pl.BlockSpec((1, C, thw), lambda b, t: (b, 0, t)),
        ),
        compiler_params=_compiler_params(("parallel", "parallel"), vmem_limit),
    )(x3, gate)
    return out3


# ---------------- public wrapper --------------------------------------------

def channel_attention(x, w1, w2, *, max_block_bytes=None):
    """x: (N, C, H, W); w1: (hidden, C, k, k); w2: (C, hidden, k, k).
    Convs have bias=False (as in the PyTorch module)."""
    N, C, H, W = x.shape
    hidden = w1.shape[0]
    k = w1.shape[-1]
    HW = H * W

    cfg = _tpu_config()
    target_bytes = cfg["target_bytes"] if max_block_bytes is None else max_block_bytes
    vmem_limit = cfg["vmem_limit"]

    # Center-tap reduction (parameter glue, done in JAX): a kxk conv with
    # padding k//2 on a 1x1 input only reads W[:, :, k//2, k//2].
    c = k // 2
    w1t = jnp.transpose(w1[:, :, c, c]).astype(jnp.float32)   # (C, hidden)
    w2t = jnp.transpose(w2[:, :, c, c]).astype(jnp.float32)   # (hidden, C)

    # Free reshape (collapses trailing contiguous dims); no lane padding --
    # HW as the block's last dim equals the full array dim.
    x3 = x.reshape(N, C, HW)
    per_batch_bytes = C * HW * x.dtype.itemsize
    bn = _choose_batch_block(N, per_batch_bytes, target_bytes, cfg["two_steps"])

    if bn is None:
        out3 = _channel_attention_spatial_tiled(x3, w1t, w2t,
                                                target_bytes, vmem_limit)
        return out3.reshape(N, C, H, W)

    out3 = pl.pallas_call(
        _channel_attention_kernel,
        out_shape=jax.ShapeDtypeStruct((N, C, HW), x.dtype),
        grid_spec=pltpu.PrefetchScalarGridSpec(
            num_scalar_prefetch=0,
            grid=(pl.cdiv(N, bn),),
            in_specs=[
                pl.BlockSpec((bn, C, HW), lambda n: (n, 0, 0)),
                # Weights are tiny; constant index_map keeps them VMEM-resident.
                pl.BlockSpec((C, hidden), lambda n: (0, 0)),
                pl.BlockSpec((hidden, C), lambda n: (0, 0)),
            ],
            out_specs=pl.BlockSpec((bn, C, HW), lambda n: (n, 0, 0)),
        ),
        compiler_params=_compiler_params(("parallel",), vmem_limit),
    )(x3, w1t, w2t)
    return out3.reshape(N, C, H, W)


# ---------------- pure-JAX reference (full kxk convs) -----------------------

def reference(x, w1, w2):
    k = w1.shape[-1]
    pad = k // 2
    avg = jnp.mean(x, axis=(2, 3), keepdims=True)    # (N,C,1,1)
    mx = jnp.max(x, axis=(2, 3), keepdims=True)      # (N,C,1,1)

    def conv_branch(v):
        h = lax.conv_general_dilated(v, w1, (1, 1), [(pad, pad), (pad, pad)],
                                     dimension_numbers=("NCHW", "OIHW", "NCHW"))
        h = jnp.maximum(h, 0.0)
        return lax.conv_general_dilated(h, w2, (1, 1), [(pad, pad), (pad, pad)],
                                        dimension_numbers=("NCHW", "OIHW", "NCHW"))

    gate = jax.nn.sigmoid(conv_branch(avg) + conv_branch(mx))
    return x * gate


if __name__ == "__main__":
    def make_inputs(N, C, H, W, reduction_ratio, key):
        hidden = max(1, C // reduction_ratio)
        k = _optimal_kernel_size(C)
        kx, kw1, kw2 = jax.random.split(key, 3)
        x = jax.random.normal(kx, (N, C, H, W), dtype=jnp.float32)
        w1 = jax.random.normal(kw1, (hidden, C, k, k), dtype=jnp.float32) * 0.1
        w2 = jax.random.normal(kw2, (C, hidden, k, k), dtype=jnp.float32) * 0.1
        return x, w1, w2

    key = jax.random.PRNGKey(0)
    k1, k2 = jax.random.split(key)

    # 1) Main single-pass path (in_channels=16, reduction_ratio=4 -> hidden=4,
    #    kernel=7 since 16 divides neither 3 nor 5).
    x, w1, w2 = make_inputs(2, 16, 16, 16, 4, k1)
    out = jax.block_until_ready(channel_attention(x, w1, w2))
    ref = reference(x, w1, w2)
    assert out.shape == x.shape and out.dtype == x.dtype
    np.testing.assert_allclose(np.asarray(out), np.asarray(ref),
                               rtol=1e-5, atol=1e-5)

    # 2) Spatial-tiling fallback, forced via a tiny block budget; H*W=225 also
    #    exercises the masked tail tile of the reduction.
    x, w1, w2 = make_inputs(2, 16, 15, 15, 4, k2)
    out = jax.block_until_ready(channel_attention(x, w1, w2,
                                                  max_block_bytes=8192))
    ref = reference(x, w1, w2)
    np.testing.assert_allclose(np.asarray(out), np.asarray(ref),
                               rtol=1e-5, atol=1e-5)

    print("KERNEL_OK")
</pallas_src>

<mosaic_0001>
module attributes {stable_mosaic.version = 11 : i64} {
  func.func @_channel_attention_kernel(%arg0: i32, %arg1: memref<2x16x256xf32, #tpu.memory_space<vmem>>, %arg2: memref<16x4xf32, #tpu.memory_space<vmem>>, %arg3: memref<4x16xf32, #tpu.memory_space<vmem>>, %arg4: memref<2x16x256xf32, #tpu.memory_space<vmem>>) attributes {dimension_semantics = [#tpu.dimension_semantics<parallel>], iteration_bounds = array<i64: 1>, scalar_prefetch = 0 : i64, scratch_operands = 0 : i64, tpu.core_type = #tpu.core_type<tc>, window_params = [{transform_indices = @transform_0, window_bounds = array<i64: 2, 16, 256>}, {pipeline_mode = #tpu.pipeline_mode<synchronous>, transform_indices = @transform_1, window_bounds = array<i64: 16, 4>}, {pipeline_mode = #tpu.pipeline_mode<synchronous>, transform_indices = @transform_2, window_bounds = array<i64: 4, 16>}, {transform_indices = @transform_3, window_bounds = array<i64: 2, 16, 256>}]} {
    %c0 = arith.constant 0 : index
    %c0_0 = arith.constant 0 : index
    %c0_1 = arith.constant 0 : index
    %0 = vector.load %arg1[%c0, %c0_0, %c0_1] : memref<2x16x256xf32, #tpu.memory_space<vmem>>, vector<2x16x256xf32>
    %cst = arith.constant dense<0.000000e+00> : vector<2x16xf32>
    %1 = vector.multi_reduction <add>, %0, %cst [2] : vector<2x16x256xf32> to vector<2x16xf32>
    %cst_2 = arith.constant 3.906250e-03 : f32
    %2 = vector.broadcast %cst_2 : f32 to vector<2x16xf32>
    %3 = arith.mulf %1, %2 : vector<2x16xf32>
    %cst_3 = arith.constant dense<0xFF800000> : vector<2x16xf32>
    %4 = vector.multi_reduction <maximumf>, %0, %cst_3 [2] : vector<2x16x256xf32> to vector<2x16xf32>
    %5 = tpu.concatenate %3, %4 in 0 : vector<2x16xf32>, vector<2x16xf32> -> vector<4x16xf32>
    %c0_4 = arith.constant 0 : index
    %c0_5 = arith.constant 0 : index
    %6 = vector.load %arg2[%c0_4, %c0_5] : memref<16x4xf32, #tpu.memory_space<vmem>>, vector<16x4xf32>
    %cst_6 = arith.constant dense<0.000000e+00> : vector<4x4xf32>
    %7 = tpu.matmul %5, %6, %cst_6 {dimension_numbers = #tpu.dot_dimension_numbers<[1], [0], [0], [1], [0, 0, 1, 1], [], []>} : vector<4x16xf32>, vector<16x4xf32>, vector<4x4xf32> -> vector<4x4xf32>
    %cst_7 = arith.constant 0.000000e+00 : f32
    %8 = vector.broadcast %cst_7 : f32 to vector<4x4xf32>
    %9 = arith.maximumf %7, %8 : vector<4x4xf32>
    %c0_8 = arith.constant 0 : index
    %c0_9 = arith.constant 0 : index
    %10 = vector.load %arg3[%c0_8, %c0_9] : memref<4x16xf32, #tpu.memory_space<vmem>>, vector<4x16xf32>
    %cst_10 = arith.constant dense<0.000000e+00> : vector<4x16xf32>
    %11 = tpu.matmul %9, %10, %cst_10 {dimension_numbers = #tpu.dot_dimension_numbers<[1], [0], [0], [1], [0, 0, 1, 1], [], []>} : vector<4x4xf32>, vector<4x16xf32>, vector<4x16xf32> -> vector<4x16xf32>
    %12 = vector.extract_strided_slice %11 {offsets = [0, 0], sizes = [2, 16], strides = [1, 1]} : vector<4x16xf32> to vector<2x16xf32>
    %13 = vector.extract_strided_slice %11 {offsets = [2, 0], sizes = [2, 16], strides = [1, 1]} : vector<4x16xf32> to vector<2x16xf32>
    %14 = arith.addf %12, %13 : vector<2x16xf32>
    %15 = arith.negf %14 : vector<2x16xf32>
    %16 = math.exp %15 : vector<2x16xf32>
    %cst_11 = arith.constant 1.000000e+00 : f32
    %17 = vector.broadcast %cst_11 : f32 to vector<2x16xf32>
    %18 = arith.addf %17, %16 : vector<2x16xf32>
    %19 = arith.divf %17, %18 : vector<2x16xf32>
    %20 = vector.shape_cast %19 : vector<2x16xf32> to vector<2x16x1xf32>
    %21 = vector.broadcast %20 : vector<2x16x1xf32> to vector<2x16x256xf32>
    %22 = arith.mulf %0, %21 : vector<2x16x256xf32>
    %c0_12 = arith.constant 0 : index
    %c0_13 = arith.constant 0 : index
    %c0_14 = arith.constant 0 : index
    %23 = vector.load %arg4[%c0_12, %c0_13, %c0_14] : memref<2x16x256xf32, #tpu.memory_space<vmem>>, vector<2x16x256xf32>
    tpu.vector_store %arg4[%c0_12, %c0_13, %c0_14], %22 {strides = array<i32>} : memref<2x16x256xf32, #tpu.memory_space<vmem>>, vector<2x16x256xf32>,
    return
  }
  func.func @transform_0(%arg0: i32) -> (i32, i32, i32) {
    %c0_i32 = arith.constant 0 : i32
    %c0_i32_0 = arith.constant 0 : i32
    %c0_i32_1 = arith.constant 0 : i32
    return %arg0, %c0_i32, %c0_i32_0 : i32, i32, i32
  }
  func.func @transform_1(%arg0: i32) -> (i32, i32) {
    %c0_i32 = arith.constant 0 : i32
    %c0_i32_0 = arith.constant 0 : i32
    %c0_i32_1 = arith.constant 0 : i32
    return %c0_i32, %c0_i32_0 : i32, i32
  }
  func.func @transform_2(%arg0: i32) -> (i32, i32) {
    %c0_i32 = arith.constant 0 : i32
    %c0_i32_0 = arith.constant 0 : i32
    %c0_i32_1 = arith.constant 0 : i32
    return %c0_i32, %c0_i32_0 : i32, i32
  }
  func.func @transform_3(%arg0: i32) -> (i32, i32, i32) {
    %c0_i32 = arith.constant 0 : i32
    %c0_i32_0 = arith.constant 0 : i32
    %c0_i32_1 = arith.constant 0 : i32
    return %arg0, %c0_i32, %c0_i32_0 : i32, i32, i32
  }
}

</mosaic_0001>

<bundles_post_ra>
// kernel: tpu_custom_call.1
= control target key start
LH: loop header
LB: loop body
LE: loop exit
PB: predicated region body
PF: predicated region fallthrough
CT: control target
= control target key end

     0   :  { %8 = vsyncpa [#allocation3], 0  ;;  %s392_s0 = inlined_call_operand.hbm [shape: f32[2,16,256], index: 0, kind: input, shape index: {}]   ;;  %s393_s1 = inlined_call_operand.vmem [shape: f32[16,4], index: 1, kind: input, shape index: {}]   ;;  %s394_s2 = inlined_call_operand.vmem [shape: f32[4,16], index: 2, kind: input, shape index: {}]   ;;  %s395_s3 = inlined_call_operand.hbm [shape: f32[2,16,256], index: 3, kind: output, shape index: {}]  }
   0x1   :  { %9 = vsyncpa [#allocation4], 0  ;;  %s14_s14 = sshll.u32 %s392_s0, 4  ;;  %s307_s15 = smov [#allocation2]   ;;  %s15_s14 = int_to_ptr.hbm [resolvable:$true] %s14_s14 }
   0x2   :  { %s16_s16 = sshll.u32 %s307_s15, 4  ;;  %s308_s17 = smov 256   ;;  %s17_s16 = int_to_ptr.vmem [resolvable:$true] %s16_s16 }
   0x3   :  { %s309_s18 = smov 16  }
   0x4   :  { %22 = dma.hbm_to_vmem [thread:$0]  %s15_s14, 1024, %s17_s16, [#allocation3], %s308_s17, %s308_s17, %s309_s18  }
   0x5   :  { %303 = dma.done.wait [#allocation3], 1024  }
   0x6   :  { %304 = vsyncadd [#allocation3], 4294966272  ;;  %v337_v0 = vld [vmem:[#allocation2 + $0x20] sm:$0xff]  ;;  %v339_v1 = vld [vmem:[#allocation2 + $0x28] sm:$0xff]  ;;  %v71_v21 = vlaneseq  ;;  %vm76_vm0 = vcmask 130112   ;;  %vm81_vm1 = vcmask 1041409  }
   0x7   :  { %v341_v2 = vld [vmem:[#allocation2] sm:$0xff]  ;;  %v45_v3 = vadd.f32 %v339_v1, %v337_v0  ;;  %v345_v4 = vld [vmem:[#allocation2 + $0x8] sm:$0xff]  ;;  %v351_v7 = vld [vmem:[#allocation2 + $0x30] sm:$0xff]  ;;  %v61_v15 = vmax.f32 %v337_v0, %v339_v1  ;;  %vm94_vm2 = vcmask 1043459   ;;  %vm97_vm3 = vcmask 1041408   ;;  %s226_s26 = sshll.u32 %s395_s3, 4  ;;  %s227_s26 = int_to_ptr.hbm [resolvable:$true] %s226_s26 }
   0x8   :  { %v55_v5 = vmax.f32 %v341_v2, %v345_v4  ;;  %v39_v6 = vadd.f32 %v345_v4, %v341_v2  ;;  %v353_v8 = vld [vmem:[#allocation2 + $0x38] sm:$0xff]  ;;  %v355_v9 = vld [vmem:[#allocation2 + $0x10] sm:$0xff]  ;;  %v100_v16 = vld [vmem:[%s393_s1 + $0x8] sm:$0xff]  ;;  %v72_v24 = vand.u32 127, %v71_v21  ;;  %vm101_vm4 = vcmask 130048  }
   0x9   :  { %46 = vadd.xlane.f32.xlu1 %v45_v3  ;;  %v357_v10 = vld [vmem:[#allocation2 + $0x18] sm:$0xff]  ;;  %v48_v11 = vadd.f32 %v353_v8, %v351_v7  ;;  %v64_v14 = vmax.f32 %v351_v7, %v353_v8  ;;  %119 = vmatpush.msra.mxu0 %v100_v16  ;;  %v99_v17 = vld [vmem:[%s393_s1] sm:$0xff]  ;;  %vm131_vm5 = vcmask 1043456   ;;  %vm127_vm6 = vcmask 31744  }
   0xa   :  { %56 = vmax.xlane.f32.xlu2 %v55_v5  ;;  %40 = vadd.xlane.f32.xlu0 %v39_v6  ;;  %v58_v12 = vmax.f32 %v355_v9, %v357_v10  ;;  %v42_v13 = vadd.f32 %v357_v10, %v355_v9  ;;  %v74_v29 = vadd.s32 4294967288, %v72_v24  ;;  %v126_v48 = vld [vmem:[%s394_s2] sm:$0xf]  ;;  %v180_v51 = vshrl.u32 %v71_v21, 7  ;;  %s310_s2 = smov [#allocation5]  }
   0xb   :  { %120 = vmatpush.msra.mxu0 %v99_v17  ;;  %240 = vmatpush.msk.msra.mxu1 %vm131_vm5, %v126_v48  ;;  %s224_s23 = sshll.u32 %s310_s2, 4  ;;  %s225_s23 = int_to_ptr.vmem [resolvable:$true] %s224_s23 }
   0xc   :  { %249 = vset.pattern.permute.xlu1 %v180_v51  ;;  %247 = vset.pattern.permute.xlu2 %v180_v51  ;;  %v187_v52 = vadd.s32 8, %v180_v51 }
   0xe   :  { %248 = vset.pattern.permute.xlu0 %v187_v52 }
  0x11   :  { %49 = vadd.xlane.f32.xlu1 %v48_v11 }
  0x12   :  { %59 = vmax.xlane.f32.xlu2 %v58_v12  ;;  %43 = vadd.xlane.f32.xlu0 %v42_v13 }
  0x19   :  { %65 = vmax.xlane.f32.xlu1 %v64_v14 }
  0x1a   :  { %62 = vmax.xlane.f32.xlu0 %v61_v15 }
  0x7c   :  { %v47_v18 = vpop.xlane.xlu1 %46 }
  0x7d   :  { %v41_v19 = vpop.xlane.xlu0 %40  ;;  %v57_v20 = vpop.xlane.xlu2 %56  ;;  %v53_v27 = vmul.f32 0.00390625, %v47_v18 }
  0x7e   :  { %v51_v28 = vmul.f32 0.00390625, %v41_v19  ;;  %v88_v34 = vperm.slane %v57_v20, %v72_v24 }
  0x7f   :  { %v78_v33 = vperm.slane %v53_v27, %v72_v24 }
  0x80   :  { %v73_v35 = vperm.slane %v51_v28, %v72_v24 }
  0x84   :  { %v50_v22 = vpop.xlane.xlu1 %49 }
  0x85   :  { %v44_v23 = vpop.xlane.xlu0 %43  ;;  %v54_v25 = vmul.f32 0.00390625, %v50_v22  ;;  %v60_v30 = vpop.xlane.xlu2 %59 }
  0x86   :  { %v52_v26 = vmul.f32 0.00390625, %v44_v23  ;;  %v89_v36 = vperm.slane %v60_v30, %v74_v29 }
  0x87   :  { %v79_v31 = vperm.slane %v54_v25, %v74_v29 }
  0x88   :  { %v75_v32 = vperm.slane %v52_v26, %v74_v29  ;;  %v90_v43 = vsel %vm76_vm0, %v89_v36, %v88_v34 }
  0x89   :  { %v80_v42 = vsel %vm76_vm0, %v79_v31, %v78_v33 }
  0x8a   :  { %v77_v41 = vsel %vm76_vm0, %v75_v32, %v73_v35 }
  0x8b   :  { %v82_v45 = vsel %vm81_vm1, %v80_v42, %v77_v41 }
  0x8c   :  { %v66_v37 = vpop.xlane.xlu1 %65 }
  0x8d   :  { %v92_v38 = vperm.slane %v66_v37, %v74_v29  ;;  %v63_v39 = vpop.xlane.xlu0 %62 }
  0x8e   :  { %v91_v40 = vperm.slane %v63_v39, %v72_v24 }
  0x90   :  { %v93_v44 = vsel %vm76_vm0, %v92_v38, %v91_v40 }
  0x91   :  { %v95_v46 = vsel %vm94_vm2, %v93_v44, %v90_v43 }
  0x92   :  { %v98_v47 = vsel %vm97_vm3, %v82_v45, %v95_v46 }
  0x93   :  { %239 = vmatmul.msk.f32.vlgmr.msra.gmra.mxu0 %vm101_vm4, %v98_v47 }
 0x110   :  { %v122_v49 = vpop.f32.mrf.mxu0 }
 0x111   :  { %v125_v50 = vmax.f32 %v122_v49, 0.0 }
 0x113   :  { %241 = vmatmul.msk.f32.vlgmr.msra.gmra.mxu1 %vm127_vm6, %v125_v50 }
 0x190   :  { %v152_v53 = vpop.f32.mrf.mxu1 }
 0x191   :  { %v156_v54 = vrot.slane %v152_v53, 2 }
 0x193   :  { %v158_v55 = vadd.f32 %v156_v54, %v152_v53 }
 0x195   :  { %v242_v56 = vmul.f32 -1.442695, %v158_v55 }
 0x197   :  { %251 = vpow2.f32 %v242_v56 }
 0x19d   :  { %v252_v57 = vpop.eup %251 }
 0x19e   :  { %v162_v58 = vadd.f32 1.0, %v252_v57 }
 0x1a0   :  { %253 = vrcp.f32 %v162_v58  ;;  %v174_v62 = vand.u32 2147483648, %v162_v58  ;;  %v172_v3 = vand.u32 2147483647, %v162_v58  ;;  %vm168_vm8 = vweird.f32 %v162_v58 }
 0x1a2   :  { %v175_v6 = vor.u32 1.1754944e-38, %v174_v62  ;;  %vm173_vm10 = vcmp.eq.f32.partialorder %v172_v3, 8.507059e+37 }
 0x1a6   :  { %v254_v59 = vpop.eup %253 }
 0x1a7   :  { %v164_v60 = vmul.f32 %v254_v59, %v162_v58  ;;  %vm169_vm7 = vweird.f32 %v254_v59 }
 0x1a8   :  { %vm170_vm9 = vmor %vm168_vm8, %vm169_vm7 }
 0x1a9   :  { %v165_v61 = vsub.f32 1.0, %v164_v60 }
 0x1ab   :  { %v166_v63 = vmul.f32 %v254_v59, %v165_v61 }
 0x1ad   :  { %v167_v5 = vadd.f32 %v254_v59, %v166_v63 }
 0x1af   :  { %v171_v11 = vsel %vm170_vm9, %v254_v59, %v167_v5 }
 0x1b0   :  { %v176_v12 = vsel %vm173_vm10, %v175_v6, %v171_v11 }
 0x1b1   :  { %v191_v13 = vperm.slane %v176_v12, 1  ;;  %v178_v14 = vperm.slane %v176_v12, 0 }
 0x1b3   :  { %196 = vperm.xlu1 %249, %v191_v13   ;;  %189 = vperm.xlu0 %248, %v178_v14  }
 0x1b4   :  { %183 = vperm.xlu2 %247, %v178_v14  }
 0x1bc   :  { %250 = vset.pattern.permute.xlu2 %v187_v52 }
 0x1c4   :  { %202 = vperm.xlu2 %250, %v191_v13  }
 0x20e   :  { %v184_v15 = vpop.permute.xlu2 %183 }
 0x20f   :  { %v204_v16 = vmul.f32 %v184_v15, %v341_v2  ;;  %v205_v17 = vmul.f32 %v184_v15, %v345_v4 }
 0x211   :  { %212 = vst [vmem:[#allocation5] sm:$0xff] %v204_v16 }
 0x212   :  { %213 = vst [vmem:[#allocation5 + $0x8] sm:$0xff] %v205_v17 }
 0x21e   :  { %v203_v18 = vpop.permute.xlu2 %202 }
 0x21f   :  { %v210_v19 = vmul.f32 %v203_v18, %v351_v7  ;;  %v211_v20 = vmul.f32 %v203_v18, %v353_v8 }
 0x221   :  { %218 = vst [vmem:[#allocation5 + $0x30] sm:$0xff] %v210_v19 }
 0x222   :  { %219 = vst [vmem:[#allocation5 + $0x38] sm:$0xff] %v211_v20 }
 0x225   :  { %v197_v21 = vpop.permute.xlu1 %196  ;;  %v190_v22 = vpop.permute.xlu0 %189 }
 0x226   :  { %v208_v23 = vmul.f32 %v197_v21, %v337_v0  ;;  %v209_v24 = vmul.f32 %v197_v21, %v339_v1  ;;  %v206_v25 = vmul.f32 %v190_v22, %v355_v9  ;;  %v207_v2 = vmul.f32 %v190_v22, %v357_v10 }
 0x228   :  { %216 = vst [vmem:[#allocation5 + $0x20] sm:$0xff] %v208_v23 }
 0x229   :  { %217 = vst [vmem:[#allocation5 + $0x28] sm:$0xff] %v209_v24 }
 0x22a   :  { %214 = vst [vmem:[#allocation5 + $0x10] sm:$0xff] %v206_v25 }
 0x22b   :  { %215 = vst [vmem:[#allocation5 + $0x18] sm:$0xff] %v207_v2 }
 0x22c   :  { %232 = dma.vmem_to_hbm [thread:$0]  %s225_s23, 1024, %s227_s26, [#allocation4], %s308_s17, %s308_s17, %s309_s18  }
 0x22d   :  { %305 = dma.done.wait [#allocation4], 1024  }
 0x22e   :  { %306 = vsyncadd [#allocation4], 4294966272 }
 0x22f   :  { %237 = vsyncpa [#allocation3], 1 }
 0x230   :  { %238 = vsyncpa [#allocation4], 1 }

</bundles_post_ra>
